<compile_context>
chip_gen: v7x
topology: tpu7x:2x2x1
jax: 0.10.0
libtpu: 0.0.40
codegen_flags: <defaults>
</compile_context>

<pallas_src>
import jax
import jax.numpy as jnp
from jax import lax
from jax.experimental import pallas as pl
from jax.experimental.pallas import tpu as pltpu

# ---- configuration (small, consistent with the module) ----
VOCAB = 50
EMB = 32                                   # emb_size
NUM_LABELS = 4                             # num_labels
B = 2                                      # batch
S = 8                                      # sequence length

CONVS = ((3, 2), (4, 2), (5, 4))           # (kernel, padding) for conv1..3
PAD = max(p for _, p in CONVS)             # global host-equivalent zero-pad = 4
L = S + 2 * PAD                            # padded time length = 16
K_MAX = max(k for k, _ in CONVS)           # 5 tap planes
FEAT = 128                                 # lane-padded feature width (3*EMB=96 -> 128)
VOCAB_PAD = ((VOCAB + 7) // 8) * 8         # 56: sublane-aligned one-hot / EW row count
ROWS = B * L + 8                           # one-hot rows + zero tail for the tap shifts
SP_ROWS = FEAT + 2                         # rows 0..127 linear W^T, 128 conv biases, 129 linear bias

assert L % 8 == 0, "copy-free (B*L,FEAT)->(B,L,FEAT) reshape needs L % 8 == 0"
assert 3 * EMB <= FEAT
assert K_MAX - 1 <= ROWS - B * L, "zero tail must cover the largest tap shift"


def cnn_regression_kernel(tok_ref, ew_ref, sp_ref, out_ref, oh_ref):
    # tok_ref: (B, S) int32 in SMEM
    # ew_ref : (VOCAB_PAD, K_MAX*FEAT) f32  -- emb table folded into conv-tap weights
    # sp_ref : (SP_ROWS, FEAT) f32          -- linear W^T (lanes 0..3), conv biases, linear bias
    # out_ref: (B, NUM_LABELS) f32          -- log-probabilities
    # oh_ref : (ROWS, VOCAB_PAD) f32 VMEM scratch -- zero-padded one-hot tokens

    # ---- in-kernel embedding gather + zero-pad: build a padded one-hot ----
    oh_ref[...] = jnp.zeros_like(oh_ref)
    lane = lax.broadcasted_iota(jnp.int32, (1, VOCAB_PAD), 1)       # hoisted out of loop
    for b in range(B):
        for s in range(S):
            tok = tok_ref[b, s]                                      # SMEM scalar
            oh_ref[pl.ds(b * L + PAD + s, 1), :] = (lane == tok).astype(jnp.float32)

    # ---- gather + pad + every tap of every conv in ONE MXU matmul (kn2row) ----
    # z[r, k*FEAT + c*EMB + o] = sum_i x_padded[r, i] * Wc[o, i, k]
    z = jnp.dot(oh_ref[...], ew_ref[...],
                preferred_element_type=jnp.float32)                  # (ROWS, K_MAX*FEAT)

    # ---- tap accumulation: 128-lane-aligned plane slices + tiny sublane shifts ----
    # acc[b*L + s, c*EMB + o] = sum_k z[b*L + s + k, k*FEAT + c*EMB + o]
    acc = z[0:B * L, 0:FEAT]
    for k in range(1, K_MAX):
        acc = acc + z[k:k + B * L, k * FEAT:(k + 1) * FEAT]
    a3 = acc.reshape(B, L, FEAT)              # copy-free: (L, FEAT) is (8,128)-tile aligned

    # ---- fused masked max-over-time for all three convs at once ----
    s_idx = lax.broadcasted_iota(jnp.int32, (B, L, FEAT), 1)
    l_idx = lax.broadcasted_iota(jnp.int32, (B, L, FEAT), 2)
    valid = l_idx >= 3 * EMB                  # zero-padded lanes: always valid (values are 0)
    for c, (ksz, pad) in enumerate(CONVS):
        off = PAD - pad
        lout = S + 2 * pad - ksz + 1
        blk = (l_idx >= c * EMB) & (l_idx < (c + 1) * EMB)
        valid = valid | (blk & (s_idx >= off) & (s_idx < off + lout))
    m = jnp.max(jnp.where(valid, a3, -1e30), axis=1)                 # (B, FEAT)

    # ---- bias (after max, time-invariant) + ReLU; single fused linear matmul ----
    conv_b = sp_ref[pl.ds(FEAT, 1), :]                                # (1, FEAT)
    feat = jnp.maximum(m + conv_b, 0.0)       # ReLU (dropout = identity in eval)
    wl = sp_ref[pl.ds(0, FEAT), :]                                    # (FEAT, FEAT), cols>=4 zero
    lin_b = sp_ref[pl.ds(FEAT + 1, 1), :]                             # (1, FEAT)
    logits = (jnp.dot(feat, wl, preferred_element_type=jnp.float32)[:, 0:NUM_LABELS]
              + lin_b[:, 0:NUM_LABELS])                               # (B, NUM_LABELS)

    # ---- log_softmax over labels ----
    zmax = jnp.max(logits, axis=-1, keepdims=True)
    zc = logits - zmax
    out_ref[...] = zc - jnp.log(jnp.sum(jnp.exp(zc), axis=-1, keepdims=True))


def pack_params(params):
    """One-time parameter packing (hoisted out of the per-call path)."""
    # Conv weights -> tap planes of width FEAT: plane k, lane block c = Wc[:,:,k]^T.
    wp = jnp.zeros((EMB, K_MAX * FEAT), jnp.float32)
    for c, (ksz, _) in enumerate(CONVS):
        w = params[f'w{c + 1}']                                       # (O, I, K) torch layout
        for k in range(ksz):
            col = k * FEAT + c * EMB
            wp = wp.at[:, col:col + EMB].set(w[:, :, k].T)            # (I, O)
    # Fold the frozen embedding table into the conv weights: EW = emb @ W_all.
    ew = jnp.zeros((VOCAB_PAD, K_MAX * FEAT), jnp.float32)
    ew = ew.at[:VOCAB, :].set(
        jnp.dot(params['emb'], wp, precision=lax.Precision.HIGHEST))

    # Small params: linear W^T (rows 0..3*EMB-1, lanes 0..3), conv biases, linear bias.
    sp = jnp.zeros((SP_ROWS, FEAT), jnp.float32)
    sp = sp.at[0:3 * EMB, 0:NUM_LABELS].set(params['wl'].T)
    for c in range(3):
        sp = sp.at[FEAT, c * EMB:(c + 1) * EMB].set(params[f'b{c + 1}'])
    sp = sp.at[FEAT + 1, 0:NUM_LABELS].set(params['bl'])
    return ew, sp


@jax.jit
def cnn_regression_forward(tokens, ew, sp):
    """Whole forward pass = one pallas_call (tokens stay int32, gather is in-kernel)."""
    return pl.pallas_call(
        cnn_regression_kernel,
        out_shape=jax.ShapeDtypeStruct((B, NUM_LABELS), jnp.float32),
        in_specs=[
            pl.BlockSpec(memory_space=pltpu.MemorySpace.SMEM),   # tokens
            pl.BlockSpec(memory_space=pltpu.MemorySpace.VMEM),   # packed emb*conv weights
            pl.BlockSpec(memory_space=pltpu.MemorySpace.VMEM),   # small params
        ],
        out_specs=pl.BlockSpec(memory_space=pltpu.MemorySpace.VMEM),
        scratch_shapes=[pltpu.VMEM((ROWS, VOCAB_PAD), jnp.float32)],
    )(tokens, ew, sp)


def reference_forward(tokens, params):
    # pure-JAX reference for validation
    e = params['emb'][tokens]                                         # (B, S, EMB)
    x = jnp.transpose(e, (0, 2, 1))                                   # (B, EMB, S)

    def conv1d(x, w, b, pad):                                         # w: (O, I, K)
        y = lax.conv_general_dilated(
            x, w, window_strides=(1,), padding=[(pad, pad)],
            dimension_numbers=('NCH', 'OIH', 'NCH'))
        return y + b[None, :, None]

    maxes = []
    for i, (_, p) in enumerate(CONVS, start=1):
        maxes.append(jnp.max(conv1d(x, params[f'w{i}'], params[f'b{i}'], p), axis=2))
    feats = jax.nn.relu(jnp.concatenate(maxes, axis=1))
    logits = feats @ params['wl'].T + params['bl'][None, :]
    return jax.nn.log_softmax(logits, axis=1)


def init_params(key):
    ks = jax.random.split(key, 9)
    return {
        'emb': jax.random.normal(ks[0], (VOCAB, EMB), jnp.float32),
        'w1':  0.1 * jax.random.normal(ks[1], (EMB, EMB, CONVS[0][0]), jnp.float32),
        'b1':  0.1 * jax.random.normal(ks[2], (EMB,), jnp.float32),
        'w2':  0.1 * jax.random.normal(ks[3], (EMB, EMB, CONVS[1][0]), jnp.float32),
        'b2':  0.1 * jax.random.normal(ks[4], (EMB,), jnp.float32),
        'w3':  0.1 * jax.random.normal(ks[5], (EMB, EMB, CONVS[2][0]), jnp.float32),
        'b3':  0.1 * jax.random.normal(ks[6], (EMB,), jnp.float32),
        'wl':  0.1 * jax.random.normal(ks[7], (NUM_LABELS, 3 * EMB), jnp.float32),
        'bl':  0.1 * jax.random.normal(ks[8], (NUM_LABELS,), jnp.float32),
    }


if __name__ == "__main__":
    key = jax.random.PRNGKey(0)
    pkey, tkey = jax.random.split(key)
    params = init_params(pkey)
    tokens = jax.random.randint(tkey, (B, S), 0, VOCAB, dtype=jnp.int32)

    # Parameter packing done ONCE (not per call).
    ew, sp = pack_params(params)

    out = jax.block_until_ready(cnn_regression_forward(tokens, ew, sp))
    ref = jax.block_until_ready(reference_forward(tokens, params))

    assert out.shape == (B, NUM_LABELS)
    assert jnp.allclose(out, ref, atol=1e-4, rtol=1e-4), (out, ref)

    print("KERNEL_OK")
</pallas_src>

<mosaic_0001>
module attributes {stable_mosaic.version = 11 : i64} {
  func.func @cnn_regression_kernel(%arg0: memref<2x8xi32, #tpu.memory_space<smem>>, %arg1: memref<56x640xf32, #tpu.memory_space<vmem>>, %arg2: memref<130x128xf32, #tpu.memory_space<vmem>>, %arg3: memref<2x4xf32, #tpu.memory_space<vmem>>, %arg4: memref<40x56xf32, #tpu.memory_space<vmem>>) attributes {dimension_semantics = [], scalar_prefetch = 0 : i64, scratch_operands = 1 : i64, tpu.core_type = #tpu.core_type<tc>} {
    %cst = arith.constant 0.000000e+00 : f32
    %0 = vector.broadcast %cst : f32 to vector<40x56xf32>
    %c0 = arith.constant 0 : index
    %c0_0 = arith.constant 0 : index
    %1 = vector.load %arg4[%c0, %c0_0] : memref<40x56xf32, #tpu.memory_space<vmem>>, vector<40x56xf32>
    tpu.vector_store %arg4[%c0, %c0_0], %0 {strides = array<i32>} : memref<40x56xf32, #tpu.memory_space<vmem>>, vector<40x56xf32>,
    %2 = tpu.iota {dimensions = array<i32: 1>} : vector<1x56xi32>
    %c0_1 = arith.constant 0 : index
    %c0_2 = arith.constant 0 : index
    %3 = memref.load %arg0[%c0_1, %c0_2] : memref<2x8xi32, #tpu.memory_space<smem>>
    %4 = vector.broadcast %3 : i32 to vector<1x56xi32>
    %5 = arith.cmpi eq, %2, %4 : vector<1x56xi32>
    %6 = arith.extui %5 : vector<1x56xi1> to vector<1x56xi32>
    %7 = arith.sitofp %6 : vector<1x56xi32> to vector<1x56xf32>
    %c4 = arith.constant 4 : index
    %c0_3 = arith.constant 0 : index
    %8 = vector.load %arg4[%c4, %c0_3] : memref<40x56xf32, #tpu.memory_space<vmem>>, vector<1x56xf32>
    tpu.vector_store %arg4[%c4, %c0_3], %7 {strides = array<i32>} : memref<40x56xf32, #tpu.memory_space<vmem>>, vector<1x56xf32>,
    %c0_4 = arith.constant 0 : index
    %c1 = arith.constant 1 : index
    %9 = memref.load %arg0[%c0_4, %c1] : memref<2x8xi32, #tpu.memory_space<smem>>
    %10 = vector.broadcast %9 : i32 to vector<1x56xi32>
    %11 = arith.cmpi eq, %2, %10 : vector<1x56xi32>
    %12 = arith.extui %11 : vector<1x56xi1> to vector<1x56xi32>
    %13 = arith.sitofp %12 : vector<1x56xi32> to vector<1x56xf32>
    %c5 = arith.constant 5 : index
    %c0_5 = arith.constant 0 : index
    %14 = vector.load %arg4[%c5, %c0_5] : memref<40x56xf32, #tpu.memory_space<vmem>>, vector<1x56xf32>
    tpu.vector_store %arg4[%c5, %c0_5], %13 {strides = array<i32>} : memref<40x56xf32, #tpu.memory_space<vmem>>, vector<1x56xf32>,
    %c0_6 = arith.constant 0 : index
    %c2 = arith.constant 2 : index
    %15 = memref.load %arg0[%c0_6, %c2] : memref<2x8xi32, #tpu.memory_space<smem>>
    %16 = vector.broadcast %15 : i32 to vector<1x56xi32>
    %17 = arith.cmpi eq, %2, %16 : vector<1x56xi32>
    %18 = arith.extui %17 : vector<1x56xi1> to vector<1x56xi32>
    %19 = arith.sitofp %18 : vector<1x56xi32> to vector<1x56xf32>
    %c6 = arith.constant 6 : index
    %c0_7 = arith.constant 0 : index
    %20 = vector.load %arg4[%c6, %c0_7] : memref<40x56xf32, #tpu.memory_space<vmem>>, vector<1x56xf32>
    tpu.vector_store %arg4[%c6, %c0_7], %19 {strides = array<i32>} : memref<40x56xf32, #tpu.memory_space<vmem>>, vector<1x56xf32>,
    %c0_8 = arith.constant 0 : index
    %c3 = arith.constant 3 : index
    %21 = memref.load %arg0[%c0_8, %c3] : memref<2x8xi32, #tpu.memory_space<smem>>
    %22 = vector.broadcast %21 : i32 to vector<1x56xi32>
    %23 = arith.cmpi eq, %2, %22 : vector<1x56xi32>
    %24 = arith.extui %23 : vector<1x56xi1> to vector<1x56xi32>
    %25 = arith.sitofp %24 : vector<1x56xi32> to vector<1x56xf32>
    %c7 = arith.constant 7 : index
    %c0_9 = arith.constant 0 : index
    %26 = vector.load %arg4[%c7, %c0_9] : memref<40x56xf32, #tpu.memory_space<vmem>>, vector<1x56xf32>
    tpu.vector_store %arg4[%c7, %c0_9], %25 {strides = array<i32>} : memref<40x56xf32, #tpu.memory_space<vmem>>, vector<1x56xf32>,
    %c0_10 = arith.constant 0 : index
    %c4_11 = arith.constant 4 : index
    %27 = memref.load %arg0[%c0_10, %c4_11] : memref<2x8xi32, #tpu.memory_space<smem>>
    %28 = vector.broadcast %27 : i32 to vector<1x56xi32>
    %29 = arith.cmpi eq, %2, %28 : vector<1x56xi32>
    %30 = arith.extui %29 : vector<1x56xi1> to vector<1x56xi32>
    %31 = arith.sitofp %30 : vector<1x56xi32> to vector<1x56xf32>
    %c8 = arith.constant 8 : index
    %c0_12 = arith.constant 0 : index
    %32 = vector.load %arg4[%c8, %c0_12] : memref<40x56xf32, #tpu.memory_space<vmem>>, vector<1x56xf32>
    tpu.vector_store %arg4[%c8, %c0_12], %31 {strides = array<i32>} : memref<40x56xf32, #tpu.memory_space<vmem>>, vector<1x56xf32>,
    %c0_13 = arith.constant 0 : index
    %c5_14 = arith.constant 5 : index
    %33 = memref.load %arg0[%c0_13, %c5_14] : memref<2x8xi32, #tpu.memory_space<smem>>
    %34 = vector.broadcast %33 : i32 to vector<1x56xi32>
    %35 = arith.cmpi eq, %2, %34 : vector<1x56xi32>
    %36 = arith.extui %35 : vector<1x56xi1> to vector<1x56xi32>
    %37 = arith.sitofp %36 : vector<1x56xi32> to vector<1x56xf32>
    %c9 = arith.constant 9 : index
    %c0_15 = arith.constant 0 : index
    %38 = vector.load %arg4[%c9, %c0_15] : memref<40x56xf32, #tpu.memory_space<vmem>>, vector<1x56xf32>
    tpu.vector_store %arg4[%c9, %c0_15], %37 {strides = array<i32>} : memref<40x56xf32, #tpu.memory_space<vmem>>, vector<1x56xf32>,
    %c0_16 = arith.constant 0 : index
    %c6_17 = arith.constant 6 : index
    %39 = memref.load %arg0[%c0_16, %c6_17] : memref<2x8xi32, #tpu.memory_space<smem>>
    %40 = vector.broadcast %39 : i32 to vector<1x56xi32>
    %41 = arith.cmpi eq, %2, %40 : vector<1x56xi32>
    %42 = arith.extui %41 : vector<1x56xi1> to vector<1x56xi32>
    %43 = arith.sitofp %42 : vector<1x56xi32> to vector<1x56xf32>
    %c10 = arith.constant 10 : index
    %c0_18 = arith.constant 0 : index
    %44 = vector.load %arg4[%c10, %c0_18] : memref<40x56xf32, #tpu.memory_space<vmem>>, vector<1x56xf32>
    tpu.vector_store %arg4[%c10, %c0_18], %43 {strides = array<i32>} : memref<40x56xf32, #tpu.memory_space<vmem>>, vector<1x56xf32>,
    %c0_19 = arith.constant 0 : index
    %c7_20 = arith.constant 7 : index
    %45 = memref.load %arg0[%c0_19, %c7_20] : memref<2x8xi32, #tpu.memory_space<smem>>
    %46 = vector.broadcast %45 : i32 to vector<1x56xi32>
    %47 = arith.cmpi eq, %2, %46 : vector<1x56xi32>
    %48 = arith.extui %47 : vector<1x56xi1> to vector<1x56xi32>
    %49 = arith.sitofp %48 : vector<1x56xi32> to vector<1x56xf32>
    %c11 = arith.constant 11 : index
    %c0_21 = arith.constant 0 : index
    %50 = vector.load %arg4[%c11, %c0_21] : memref<40x56xf32, #tpu.memory_space<vmem>>, vector<1x56xf32>
    tpu.vector_store %arg4[%c11, %c0_21], %49 {strides = array<i32>} : memref<40x56xf32, #tpu.memory_space<vmem>>, vector<1x56xf32>,
    %c1_22 = arith.constant 1 : index
    %c0_23 = arith.constant 0 : index
    %51 = memref.load %arg0[%c1_22, %c0_23] : memref<2x8xi32, #tpu.memory_space<smem>>
    %52 = vector.broadcast %51 : i32 to vector<1x56xi32>
    %53 = arith.cmpi eq, %2, %52 : vector<1x56xi32>
    %54 = arith.extui %53 : vector<1x56xi1> to vector<1x56xi32>
    %55 = arith.sitofp %54 : vector<1x56xi32> to vector<1x56xf32>
    %c20 = arith.constant 20 : index
    %c0_24 = arith.constant 0 : index
    %56 = vector.load %arg4[%c20, %c0_24] : memref<40x56xf32, #tpu.memory_space<vmem>>, vector<1x56xf32>
    tpu.vector_store %arg4[%c20, %c0_24], %55 {strides = array<i32>} : memref<40x56xf32, #tpu.memory_space<vmem>>, vector<1x56xf32>,
    %c1_25 = arith.constant 1 : index
    %c1_26 = arith.constant 1 : index
    %57 = memref.load %arg0[%c1_25, %c1_26] : memref<2x8xi32, #tpu.memory_space<smem>>
    %58 = vector.broadcast %57 : i32 to vector<1x56xi32>
    %59 = arith.cmpi eq, %2, %58 : vector<1x56xi32>
    %60 = arith.extui %59 : vector<1x56xi1> to vector<1x56xi32>
    %61 = arith.sitofp %60 : vector<1x56xi32> to vector<1x56xf32>
    %c21 = arith.constant 21 : index
    %c0_27 = arith.constant 0 : index
    %62 = vector.load %arg4[%c21, %c0_27] : memref<40x56xf32, #tpu.memory_space<vmem>>, vector<1x56xf32>
    tpu.vector_store %arg4[%c21, %c0_27], %61 {strides = array<i32>} : memref<40x56xf32, #tpu.memory_space<vmem>>, vector<1x56xf32>,
    %c1_28 = arith.constant 1 : index
    %c2_29 = arith.constant 2 : index
    %63 = memref.load %arg0[%c1_28, %c2_29] : memref<2x8xi32, #tpu.memory_space<smem>>
    %64 = vector.broadcast %63 : i32 to vector<1x56xi32>
    %65 = arith.cmpi eq, %2, %64 : vector<1x56xi32>
    %66 = arith.extui %65 : vector<1x56xi1> to vector<1x56xi32>
    %67 = arith.sitofp %66 : vector<1x56xi32> to vector<1x56xf32>
    %c22 = arith.constant 22 : index
    %c0_30 = arith.constant 0 : index
    %68 = vector.load %arg4[%c22, %c0_30] : memref<40x56xf32, #tpu.memory_space<vmem>>, vector<1x56xf32>
    tpu.vector_store %arg4[%c22, %c0_30], %67 {strides = array<i32>} : memref<40x56xf32, #tpu.memory_space<vmem>>, vector<1x56xf32>,
    %c1_31 = arith.constant 1 : index
    %c3_32 = arith.constant 3 : index
    %69 = memref.load %arg0[%c1_31, %c3_32] : memref<2x8xi32, #tpu.memory_space<smem>>
    %70 = vector.broadcast %69 : i32 to vector<1x56xi32>
    %71 = arith.cmpi eq, %2, %70 : vector<1x56xi32>
    %72 = arith.extui %71 : vector<1x56xi1> to vector<1x56xi32>
    %73 = arith.sitofp %72 : vector<1x56xi32> to vector<1x56xf32>
    %c23 = arith.constant 23 : index
    %c0_33 = arith.constant 0 : index
    %74 = vector.load %arg4[%c23, %c0_33] : memref<40x56xf32, #tpu.memory_space<vmem>>, vector<1x56xf32>
    tpu.vector_store %arg4[%c23, %c0_33], %73 {strides = array<i32>} : memref<40x56xf32, #tpu.memory_space<vmem>>, vector<1x56xf32>,
    %c1_34 = arith.constant 1 : index
    %c4_35 = arith.constant 4 : index
    %75 = memref.load %arg0[%c1_34, %c4_35] : memref<2x8xi32, #tpu.memory_space<smem>>
    %76 = vector.broadcast %75 : i32 to vector<1x56xi32>
    %77 = arith.cmpi eq, %2, %76 : vector<1x56xi32>
    %78 = arith.extui %77 : vector<1x56xi1> to vector<1x56xi32>
    %79 = arith.sitofp %78 : vector<1x56xi32> to vector<1x56xf32>
    %c24 = arith.constant 24 : index
    %c0_36 = arith.constant 0 : index
    %80 = vector.load %arg4[%c24, %c0_36] : memref<40x56xf32, #tpu.memory_space<vmem>>, vector<1x56xf32>
    tpu.vector_store %arg4[%c24, %c0_36], %79 {strides = array<i32>} : memref<40x56xf32, #tpu.memory_space<vmem>>, vector<1x56xf32>,
    %c1_37 = arith.constant 1 : index
    %c5_38 = arith.constant 5 : index
    %81 = memref.load %arg0[%c1_37, %c5_38] : memref<2x8xi32, #tpu.memory_space<smem>>
    %82 = vector.broadcast %81 : i32 to vector<1x56xi32>
    %83 = arith.cmpi eq, %2, %82 : vector<1x56xi32>
    %84 = arith.extui %83 : vector<1x56xi1> to vector<1x56xi32>
    %85 = arith.sitofp %84 : vector<1x56xi32> to vector<1x56xf32>
    %c25 = arith.constant 25 : index
    %c0_39 = arith.constant 0 : index
    %86 = vector.load %arg4[%c25, %c0_39] : memref<40x56xf32, #tpu.memory_space<vmem>>, vector<1x56xf32>
    tpu.vector_store %arg4[%c25, %c0_39], %85 {strides = array<i32>} : memref<40x56xf32, #tpu.memory_space<vmem>>, vector<1x56xf32>,
    %c1_40 = arith.constant 1 : index
    %c6_41 = arith.constant 6 : index
    %87 = memref.load %arg0[%c1_40, %c6_41] : memref<2x8xi32, #tpu.memory_space<smem>>
    %88 = vector.broadcast %87 : i32 to vector<1x56xi32>
    %89 = arith.cmpi eq, %2, %88 : vector<1x56xi32>
    %90 = arith.extui %89 : vector<1x56xi1> to vector<1x56xi32>
    %91 = arith.sitofp %90 : vector<1x56xi32> to vector<1x56xf32>
    %c26 = arith.constant 26 : index
    %c0_42 = arith.constant 0 : index
    %92 = vector.load %arg4[%c26, %c0_42] : memref<40x56xf32, #tpu.memory_space<vmem>>, vector<1x56xf32>
    tpu.vector_store %arg4[%c26, %c0_42], %91 {strides = array<i32>} : memref<40x56xf32, #tpu.memory_space<vmem>>, vector<1x56xf32>,
    %c1_43 = arith.constant 1 : index
    %c7_44 = arith.constant 7 : index
    %93 = memref.load %arg0[%c1_43, %c7_44] : memref<2x8xi32, #tpu.memory_space<smem>>
    %94 = vector.broadcast %93 : i32 to vector<1x56xi32>
    %95 = arith.cmpi eq, %2, %94 : vector<1x56xi32>
    %96 = arith.extui %95 : vector<1x56xi1> to vector<1x56xi32>
    %97 = arith.sitofp %96 : vector<1x56xi32> to vector<1x56xf32>
    %c27 = arith.constant 27 : index
    %c0_45 = arith.constant 0 : index
    %98 = vector.load %arg4[%c27, %c0_45] : memref<40x56xf32, #tpu.memory_space<vmem>>, vector<1x56xf32>
    tpu.vector_store %arg4[%c27, %c0_45], %97 {strides = array<i32>} : memref<40x56xf32, #tpu.memory_space<vmem>>, vector<1x56xf32>,
    %c0_46 = arith.constant 0 : index
    %c0_47 = arith.constant 0 : index
    %99 = vector.load %arg4[%c0_46, %c0_47] : memref<40x56xf32, #tpu.memory_space<vmem>>, vector<40x56xf32>
    %c0_48 = arith.constant 0 : index
    %c0_49 = arith.constant 0 : index
    %100 = vector.load %arg1[%c0_48, %c0_49] : memref<56x640xf32, #tpu.memory_space<vmem>>, vector<56x640xf32>
    %cst_50 = arith.constant dense<0.000000e+00> : vector<40x640xf32>
    %101 = tpu.matmul %99, %100, %cst_50 {dimension_numbers = #tpu.dot_dimension_numbers<[1], [0], [0], [1], [0, 0, 1, 1], [], []>} : vector<40x56xf32>, vector<56x640xf32>, vector<40x640xf32> -> vector<40x640xf32>
    %102 = vector.extract_strided_slice %101 {offsets = [0, 0], sizes = [32, 128], strides = [1, 1]} : vector<40x640xf32> to vector<32x128xf32>
    %103 = vector.extract_strided_slice %101 {offsets = [1, 128], sizes = [32, 128], strides = [1, 1]} : vector<40x640xf32> to vector<32x128xf32>
    %104 = arith.addf %102, %103 : vector<32x128xf32>
    %105 = vector.extract_strided_slice %101 {offsets = [2, 256], sizes = [32, 128], strides = [1, 1]} : vector<40x640xf32> to vector<32x128xf32>
    %106 = arith.addf %104, %105 : vector<32x128xf32>
    %107 = vector.extract_strided_slice %101 {offsets = [3, 384], sizes = [32, 128], strides = [1, 1]} : vector<40x640xf32> to vector<32x128xf32>
    %108 = arith.addf %106, %107 : vector<32x128xf32>
    %109 = vector.extract_strided_slice %101 {offsets = [4, 512], sizes = [32, 128], strides = [1, 1]} : vector<40x640xf32> to vector<32x128xf32>
    %110 = arith.addf %108, %109 : vector<32x128xf32>
    %111 = vector.shape_cast %110 : vector<32x128xf32> to vector<2x16x128xf32>
    %112 = tpu.iota {dimensions = array<i32: 1>} : vector<2x16x128xi32>
    %113 = tpu.iota {dimensions = array<i32: 2>} : vector<2x16x128xi32>
    %c96_i32 = arith.constant 96 : i32
    %114 = vector.broadcast %c96_i32 : i32 to vector<2x16x128xi32>
    %115 = arith.cmpi sge, %113, %114 : vector<2x16x128xi32>
    %c0_i32 = arith.constant 0 : i32
    %116 = vector.broadcast %c0_i32 : i32 to vector<2x16x128xi32>
    %117 = arith.cmpi sge, %113, %116 : vector<2x16x128xi32>
    %c32_i32 = arith.constant 32 : i32
    %118 = vector.broadcast %c32_i32 : i32 to vector<2x16x128xi32>
    %119 = arith.cmpi slt, %113, %118 : vector<2x16x128xi32>
    %120 = arith.andi %117, %119 : vector<2x16x128xi1>
    %c2_i32 = arith.constant 2 : i32
    %121 = vector.broadcast %c2_i32 : i32 to vector<2x16x128xi32>
    %122 = arith.cmpi sge, %112, %121 : vector<2x16x128xi32>
    %123 = arith.andi %120, %122 : vector<2x16x128xi1>
    %c12_i32 = arith.constant 12 : i32
    %124 = vector.broadcast %c12_i32 : i32 to vector<2x16x128xi32>
    %125 = arith.cmpi slt, %112, %124 : vector<2x16x128xi32>
    %126 = arith.andi %123, %125 : vector<2x16x128xi1>
    %127 = arith.ori %115, %126 : vector<2x16x128xi1>
    %c32_i32_51 = arith.constant 32 : i32
    %128 = vector.broadcast %c32_i32_51 : i32 to vector<2x16x128xi32>
    %129 = arith.cmpi sge, %113, %128 : vector<2x16x128xi32>
    %c64_i32 = arith.constant 64 : i32
    %130 = vector.broadcast %c64_i32 : i32 to vector<2x16x128xi32>
    %131 = arith.cmpi slt, %113, %130 : vector<2x16x128xi32>
    %132 = arith.andi %129, %131 : vector<2x16x128xi1>
    %c2_i32_52 = arith.constant 2 : i32
    %133 = vector.broadcast %c2_i32_52 : i32 to vector<2x16x128xi32>
    %134 = arith.cmpi sge, %112, %133 : vector<2x16x128xi32>
    %135 = arith.andi %132, %134 : vector<2x16x128xi1>
    %c11_i32 = arith.constant 11 : i32
    %136 = vector.broadcast %c11_i32 : i32 to vector<2x16x128xi32>
    %137 = arith.cmpi slt, %112, %136 : vector<2x16x128xi32>
    %138 = arith.andi %135, %137 : vector<2x16x128xi1>
    %139 = arith.ori %127, %138 : vector<2x16x128xi1>
    %c64_i32_53 = arith.constant 64 : i32
    %140 = vector.broadcast %c64_i32_53 : i32 to vector<2x16x128xi32>
    %141 = arith.cmpi sge, %113, %140 : vector<2x16x128xi32>
    %c96_i32_54 = arith.constant 96 : i32
    %142 = vector.broadcast %c96_i32_54 : i32 to vector<2x16x128xi32>
    %143 = arith.cmpi slt, %113, %142 : vector<2x16x128xi32>
    %144 = arith.andi %141, %143 : vector<2x16x128xi1>
    %c0_i32_55 = arith.constant 0 : i32
    %145 = vector.broadcast %c0_i32_55 : i32 to vector<2x16x128xi32>
    %146 = arith.cmpi sge, %112, %145 : vector<2x16x128xi32>
    %147 = arith.andi %144, %146 : vector<2x16x128xi1>
    %c12_i32_56 = arith.constant 12 : i32
    %148 = vector.broadcast %c12_i32_56 : i32 to vector<2x16x128xi32>
    %149 = arith.cmpi slt, %112, %148 : vector<2x16x128xi32>
    %150 = arith.andi %147, %149 : vector<2x16x128xi1>
    %151 = arith.ori %139, %150 : vector<2x16x128xi1>
    %cst_57 = arith.constant -1.000000e+30 : f32
    %152 = vector.broadcast %cst_57 : f32 to vector<2x16x128xf32>
    %153 = arith.select %151, %111, %152 : vector<2x16x128xi1>, vector<2x16x128xf32>
    %cst_58 = arith.constant dense<0xFF800000> : vector<2x128xf32>
    %154 = vector.multi_reduction <maximumf>, %153, %cst_58 [1] : vector<2x16x128xf32> to vector<2x128xf32>
    %c128 = arith.constant 128 : index
    %c0_59 = arith.constant 0 : index
    %155 = vector.load %arg2[%c128, %c0_59] : memref<130x128xf32, #tpu.memory_space<vmem>>, vector<1x128xf32>
    %156 = vector.broadcast %155 : vector<1x128xf32> to vector<2x128xf32>
    %157 = arith.addf %154, %156 : vector<2x128xf32>
    %cst_60 = arith.constant 0.000000e+00 : f32
    %158 = vector.broadcast %cst_60 : f32 to vector<2x128xf32>
    %159 = arith.maximumf %157, %158 : vector<2x128xf32>
    %c0_61 = arith.constant 0 : index
    %c0_62 = arith.constant 0 : index
    %160 = vector.load %arg2[%c0_61, %c0_62] : memref<130x128xf32, #tpu.memory_space<vmem>>, vector<128x128xf32>
    %c129 = arith.constant 129 : index
    %c0_63 = arith.constant 0 : index
    %161 = vector.load %arg2[%c129, %c0_63] : memref<130x128xf32, #tpu.memory_space<vmem>>, vector<1x128xf32>
    %cst_64 = arith.constant dense<0.000000e+00> : vector<2x128xf32>
    %162 = tpu.matmul %159, %160, %cst_64 {dimension_numbers = #tpu.dot_dimension_numbers<[1], [0], [0], [1], [0, 0, 1, 1], [], []>} : vector<2x128xf32>, vector<128x128xf32>, vector<2x128xf32> -> vector<2x128xf32>
    %163 = vector.extract_strided_slice %162 {offsets = [0, 0], sizes = [2, 4], strides = [1, 1]} : vector<2x128xf32> to vector<2x4xf32>
    %164 = vector.extract_strided_slice %161 {offsets = [0, 0], sizes = [1, 4], strides = [1, 1]} : vector<1x128xf32> to vector<1x4xf32>
    %165 = vector.broadcast %164 : vector<1x4xf32> to vector<2x4xf32>
    %166 = arith.addf %163, %165 : vector<2x4xf32>
    %cst_65 = arith.constant dense<0xFF800000> : vector<2xf32>
    %167 = vector.multi_reduction <maximumf>, %166, %cst_65 [1] : vector<2x4xf32> to vector<2xf32>
    %168 = vector.shape_cast %167 : vector<2xf32> to vector<2x1xf32>
    %169 = vector.broadcast %168 : vector<2x1xf32> to vector<2x4xf32>
    %170 = arith.subf %166, %169 : vector<2x4xf32>
    %171 = math.exp %170 : vector<2x4xf32>
    %cst_66 = arith.constant dense<0.000000e+00> : vector<2xf32>
    %172 = vector.multi_reduction <add>, %171, %cst_66 [1] : vector<2x4xf32> to vector<2xf32>
    %173 = vector.shape_cast %172 : vector<2xf32> to vector<2x1xf32>
    %174 = math.log %173 : vector<2x1xf32>
    %175 = vector.broadcast %174 : vector<2x1xf32> to vector<2x4xf32>
    %176 = arith.subf %170, %175 : vector<2x4xf32>
    %c0_67 = arith.constant 0 : index
    %c0_68 = arith.constant 0 : index
    %177 = vector.load %arg3[%c0_67, %c0_68] : memref<2x4xf32, #tpu.memory_space<vmem>>, vector<2x4xf32>
    tpu.vector_store %arg3[%c0_67, %c0_68], %176 {strides = array<i32>} : memref<2x4xf32, #tpu.memory_space<vmem>>, vector<2x4xf32>,
    return
  }
}

</mosaic_0001>

<bundles_post_ra>
// kernel: cnn_regression_forward.1
= control target key start
LH: loop header
LB: loop body
LE: loop exit
PB: predicated region body
PF: predicated region fallthrough
CT: control target
= control target key end

     0   :  { %8 = vsyncpa [#allocation6], 0  ;;  %s1397_s0 = inlined_call_operand.hbm [shape: s32[2,8], index: 0, kind: input, shape index: {}]   ;;  %s1398_s1 = inlined_call_operand.hbm [shape: f32[56,640], index: 1, kind: input, shape index: {}]   ;;  %s1399_s2 = inlined_call_operand.hbm [shape: f32[130,128], index: 2, kind: input, shape index: {}]   ;;  %s1400_s3 = inlined_call_operand.hbm [shape: f32[2,4], index: 3, kind: output, shape index: {}]  }
   0x1   :  { %9 = vsyncpa [#allocation4], 0 }
   0x2   :  { %10 = vsyncpa [#allocation9], 0 }
   0x3   :  { %11 = vsyncpa [#allocation5], 0  ;;  %s993_s14 = scalar_lea.hbm %s1397_s0, 32 }
   0x4   :  { %p994_p0 = scmp.ne.s32.totalorder %s1397_s0, %s993_s14  ;;  %p997_p1 = scmp.lt.u32.totalorder %s993_s14, %s1397_s0 }
   0x6   :  { %p999_p2 = pnand %p997_p1, %p994_p0 }
   0x8   :  { %1002 = shalt.err (!%p999_p2)
}
   0x9   :  { %s1077_s19 = smov [#allocation3]   ;;  %s1078_s22 = smov [#allocation7]  }
   0xa   :  { %19 = dma.hbm_to_smem %s1397_s0, 32, %s1077_s19, [#allocation6]  }
   0xb   :  { %s25_s23 = sshll.u32 %s1078_s22, 4  ;;  %s1003_s26 = scalar_lea.hbm %s1398_s1, 4480  ;;  %s26_s23 = int_to_ptr.vmem [resolvable:$true] %s25_s23 }
   0xc   :  { %p1004_p3 = scmp.ne.s32.totalorder %s1398_s1, %s1003_s26  ;;  %p1007_p4 = scmp.lt.u32.totalorder %s1003_s26, %s1398_s1 }
   0xe   :  { %p1009_p5 = pnand %p1007_p4, %p1004_p3 }
  0x10   :  { %1012 = shalt.err (!%p1009_p5)
}
  0x11   :  { %s1013_s4 = scalar_lea.vmem %s26_s23, 4480  ;;  %p1018_p7 = scmp.lt.s32.totalorder %s26_s23, %s26_s23 }
  0x12   :  { %p1014_p6 = scmp.ne.s32.totalorder %s26_s23, %s1013_s4  ;;  %p1019_p8 = scmp.lt.s32.totalorder %s1013_s4, %s1013_s4 }
  0x14   :  { %p1020_p9 = por %p1019_p8, %p1018_p7 }
  0x16   :  { %p1021_p10 = pnand %p1020_p9, %p1014_p6 }
  0x18   :  { %1024 = shalt.err (!%p1021_p10)
}
  0x19   :  { %s1079_s0 = smov 640   ;;  %s1080_s5 = smov 40  }
  0x1a   :  { %31 = dma.hbm_to_vmem [thread:$0]  %s1398_s1, 4480, %s26_s23, [#allocation4], %s1079_s0, %s1079_s0, %s1080_s5  }
  0x1b   :  { %s1081_s8 = smov [#allocation8]   ;;  %s1025_s12 = scalar_lea.hbm %s1399_s2, 2176 }
  0x1c   :  { %s37_s9 = sshll.u32 %s1081_s8, 4  ;;  %p1026_p11 = scmp.ne.s32.totalorder %s1399_s2, %s1025_s12  ;;  %s38_s9 = int_to_ptr.vmem [resolvable:$true] %s37_s9 }
  0x1d   :  { %p1029_p12 = scmp.lt.u32.totalorder %s1025_s12, %s1399_s2 }
  0x1f   :  { %p1031_p13 = pnand %p1029_p12, %p1026_p11 }
  0x21   :  { %1034 = shalt.err (!%p1031_p13)
}
  0x22   :  { %s1035_s17 = scalar_lea.vmem %s38_s9, 2176  ;;  %p1040_p1 = scmp.lt.s32.totalorder %s38_s9, %s38_s9 }
  0x23   :  { %p1036_p0 = scmp.ne.s32.totalorder %s38_s9, %s1035_s17  ;;  %p1041_p2 = scmp.lt.s32.totalorder %s1035_s17, %s1035_s17 }
  0x25   :  { %p1042_p3 = por %p1041_p2, %p1040_p1 }
  0x27   :  { %p1043_p4 = pnand %p1042_p3, %p1036_p0 }
  0x29   :  { %1046 = shalt.err (!%p1043_p4)
}
  0x2a   :  { %s1082_s1 = smov 128   ;;  %s1083_s18 = smov 8  }
  0x2b   :  { %43 = dma.hbm_to_vmem [thread:$0]  %s1399_s2, 2176, %s38_s9, [#allocation9], %s1082_s1, %s1082_s1, %s1083_s18  }
  0x2c   :  { %1069 = dma.done.wait [#allocation6], 32  }
  0x2d   :  { %1070 = vsyncadd [#allocation6], 4294967264 }
  0x2e   :  { %1071 = dma.done.wait [#allocation4], 4480  }
  0x2f   :  { %1072 = vsyncadd [#allocation4], 4294962816 }
  0x30   :  { %1073 = dma.done.wait [#allocation9], 2176  }
  0x31   :  { %1074 = vsyncadd [#allocation9], 4294965120 }
  0x32   :  { %53 = sfence }
  0x33   :  { %v165_v0 = vld [vmem:[#allocation7 + $0x8] sm:$0xff]  ;;  %v170_v1 = vld [vmem:[#allocation7 + $0x30] sm:$0xff]  ;;  %v164_v2 = vld [vmem:[#allocation7] sm:$0xff]  ;;  %vm54_vm0 = vcmask 457728   ;;  %v60_v3 = vlaneseq  ;;  %v1084_v8 = vmov 0.0   ;;  %s1147_s2 = sld [smem:[#allocation3]] }
  0x34   :  { %v921_v4 = vpack.c.bf16 %v170_v1, %v165_v0  ;;  %v169_v5 = vld [vmem:[#allocation7 + $0x28] sm:$0xff]  ;;  %v167_v6 = vld [vmem:[#allocation7 + $0x18] sm:$0xff]  ;;  %v172_v7 = vld [vmem:[#allocation7 + $0x40] sm:$0xff]  ;;  %278 = vmatprep.mubr.f32.mxu0 %v1084_v8  ;;  %55 = vst.msk [vmem:[#allocation2] sm:$0xff] %vm54_vm0, %v1084_v8  ;;  %372 = vmatprep.mubr.f32.mxu1 %v1084_v8  ;;  %s1158_s21 = sld [smem:[#allocation3 + $0x1]]  ;;  %s1160_s22 = sld [smem:[#allocation3 + $0x2]] }
  0x35   :  { %56 = vst.msk [vmem:[#allocation2 + $0x8] sm:$0xff] %vm54_vm0, %v1084_v8  ;;  %57 = vst.msk [vmem:[#allocation2 + $0x10] sm:$0xff] %vm54_vm0, %v1084_v8  ;;  %v923_v9 = vpack.c.bf16 %v169_v5, %v164_v2  ;;  %v933_v10 = vpack.c.bf16 %v172_v7, %v167_v6  ;;  %v175_v11 = vld [vmem:[#allocation7 + $0x58] sm:$0xff]  ;;  %v180_v12 = vld [vmem:[#allocation7 + $0x80] sm:$0xff]  ;;  %v1163_v23 = vand.u32 127, %v60_v3  ;;  %s1165_s23 = sld [smem:[#allocation3 + $0x3]] }
  0x36   :  { %58 = vst.msk [vmem:[#allocation2 + $0x18] sm:$0xff] %vm54_vm0, %v1084_v8  ;;  %59 = vst.msk [vmem:[#allocation2 + $0x20] sm:$0xff] %vm54_vm0, %v1084_v8  ;;  %v166_v13 = vld [vmem:[#allocation7 + $0x10] sm:$0xff]  ;;  %922 = vmatprep.subr.bf16.mxu0 %v921_v4  ;;  %v925_v14 = vpack.c.bf16 %v180_v12, %v175_v11  ;;  %v171_v15 = vld [vmem:[#allocation7 + $0x38] sm:$0xff]  ;;  %s1167_s24 = sld [smem:[#allocation3 + $0x4]]  ;;  %s1169_s25 = sld [smem:[#allocation3 + $0x5]] }
  0x37   :  { %v174_v16 = vld [vmem:[#allocation7 + $0x50] sm:$0xff]  ;;  %v179_v17 = vld [vmem:[#allocation7 + $0x78] sm:$0xff]  ;;  %924 = vmatpush1.bf16.msra.mxu0 %v923_v9  ;;  %934 = vmatprep.subr.bf16.mxu1 %v933_v10  ;;  %v935_v18 = vpack.c.bf16 %v171_v15, %v166_v13  ;;  %v177_v20 = vld [vmem:[#allocation7 + $0x68] sm:$0xff]  ;;  %vm67_vm1 = vcmask 450560   ;;  %s1172_s26 = sld [smem:[#allocation3 + $0x6]]  ;;  %s1176_s27 = sld [smem:[#allocation3 + $0x7]] }
  0x38   :  { %v927_v19 = vpack.c.bf16 %v179_v17, %v174_v16  ;;  %v182_v21 = vld [vmem:[#allocation7 + $0x90] sm:$0xff]  ;;  %v185_v22 = vld [vmem:[#allocation7 + $0xa8] sm:$0xff]  ;;  %926 = vmatprep.subr.bf16.mxu0 %v925_v14  ;;  %v176_v26 = vld [vmem:[#allocation7 + $0x60] sm:$0xff]  ;;  %s1181_s28 = sld [smem:[#allocation3 + $0x80]]  ;;  %s1187_s29 = sld [smem:[#allocation3 + $0x81]]  ;;  %v1085_v0 = vmov 0.0|0.0  }
  0x39   :  { %v937_v24 = vpack.c.bf16 %v182_v21, %v177_v20  ;;  %v190_v25 = vld [vmem:[#allocation7 + $0xd0] sm:$0xff]  ;;  %v181_v27 = vld [vmem:[#allocation7 + $0x88] sm:$0xff]  ;;  %936 = vmatpush1.bf16.msra.mxu1 %v935_v18  ;;  %v184_v30 = vld [vmem:[#allocation7 + $0xa0] sm:$0xff]  ;;  %v63_v35 = vstv %s1147_s2  ;;  %s1193_s30 = sld [smem:[#allocation3 + $0x82]]  ;;  %s1195_s4 = sld [smem:[#allocation3 + $0x83]] }
  0x3a   :  { %v929_v28 = vpack.c.bf16 %v190_v25, %v185_v22  ;;  %v939_v29 = vpack.c.bf16 %v181_v27, %v176_v26  ;;  %v189_v31 = vld [vmem:[#allocation7 + $0xc8] sm:$0xff]  ;;  %v187_v32 = vld [vmem:[#allocation7 + $0xb8] sm:$0xff]  ;;  %v192_v33 = vld [vmem:[#allocation7 + $0xe0] sm:$0xff]  ;;  %vm64_vm2 = vcmp.eq.s32.totalorder %v1163_v23, %v63_v35  ;;  %v70_v39 = vstv %s1158_s21  ;;  %s1203_s0 = sld [smem:[#allocation3 + $0x84]]  ;;  %s1205_s5 = sld [smem:[#allocation3 + $0x85]] }
  0x3b   :  { %938 = vmatprep.subr.bf16.mxu1 %v937_v24  ;;  %v186_v34 = vld [vmem:[#allocation7 + $0xb0] sm:$0xff]  ;;  %928 = vmatpush1.bf16.msra.mxu0 %v927_v19  ;;  %v931_v36 = vpack.c.bf16 %v189_v31, %v184_v30  ;;  %v941_v37 = vpack.c.bf16 %v192_v33, %v187_v32  ;;  %v191_v38 = vld [vmem:[#allocation7 + $0xd8] sm:$0xff]  ;;  %v780_v40 = vsel %vm64_vm2, 1.0, %v1084_v8  ;;  %vm71_vm3 = vcmp.eq.s32.totalorder %v1163_v23, %v70_v39  ;;  %v197_v48 = vld [vmem:[#allocation7 + $0x108] sm:$0xff]  ;;  %s1211_s6 = sld [smem:[#allocation3 + $0x86]]  ;;  %s1213_s7 = sld [smem:[#allocation3 + $0x87]] }
  0x3c   :  { %930 = vmatprep.subr.bf16.mxu0 %v929_v28  ;;  %v76_v41 = vstv %s1160_s22  ;;  %v195_v42 = vld [vmem:[#allocation7 + $0xf8] sm:$0xff]  ;;  %v943_v43 = vpack.c.bf16 %v191_v38, %v186_v34  ;;  %68 = vst.msk [vmem:[#allocation2 + $0x4] sm:$0x1] %vm67_vm1, %v780_v40  ;;  %v782_v44 = vsel %vm71_vm3, 1.0, %v1084_v8  ;;  %v82_v45 = vstv %s1165_s23  ;;  %v194_v46 = vld [vmem:[#allocation7 + $0xf0] sm:$0xff]  ;;  %v1199_v51 = vld [vmem:[#allocation7 + $0x20] sm:$0xff] }
  0x3d   :  { %940 = vmatpush1.bf16.msra.mxu1 %v939_v29  ;;  %vm77_vm4 = vcmp.eq.s32.totalorder %v1163_v23, %v76_v41  ;;  %74 = vst.msk [vmem:[#allocation2 + $0x5] sm:$0x1] %vm67_vm1, %v782_v44  ;;  %vm83_vm5 = vcmp.eq.s32.totalorder %v1163_v23, %v82_v45  ;;  %v88_v49 = vstv %s1167_s24  ;;  %v94_v52 = vstv %s1169_s25  ;;  %v173_v53 = vld [vmem:[#allocation7 + $0x48] sm:$0xff]  ;;  %v196_v58 = vld [vmem:[#allocation7 + $0x100] sm:$0xff]  ;;  %v178_v7 = vld [vmem:[#allocation7 + $0x70] sm:$0xff]  ;;  %s1087_s8 = smov [#allocation10]  }
  0x3e   :  { %942 = vmatprep.subr.bf16.mxu1 %v941_v37  ;;  %v784_v47 = vsel %vm77_vm4, 1.0, %v1084_v8  ;;  %v786_v50 = vsel %vm83_vm5, 1.0, %v1084_v8  ;;  %vm89_vm6 = vcmp.eq.s32.totalorder %v1163_v23, %v88_v49  ;;  %vm95_vm7 = vcmp.eq.s32.totalorder %v1163_v23, %v94_v52  ;;  %v183_v9 = vld [vmem:[#allocation7 + $0x98] sm:$0xff]  ;;  %v188_v21 = vld [vmem:[#allocation7 + $0xc0] sm:$0xff]  ;;  %v193_v22 = vld [vmem:[#allocation7 + $0xe8] sm:$0xff]  ;;  %s769_s9 = sshll.u32 %s1087_s8, 4  ;;  %s770_s9 = int_to_ptr.vmem [resolvable:$true] %s769_s9 }
  0x3f   :  { %932 = vmatpush1.bf16.msra.mxu0 %v931_v36  ;;  %80 = vst.msk [vmem:[#allocation2 + $0x6] sm:$0x1] %vm67_vm1, %v784_v47  ;;  %86 = vst.msk [vmem:[#allocation2 + $0x7] sm:$0x1] %vm67_vm1, %v786_v50  ;;  %v788_v54 = vsel %vm89_vm6, 1.0, %v1084_v8  ;;  %v100_v55 = vstv %s1172_s26  ;;  %v790_v56 = vsel %vm95_vm7, 1.0, %v1084_v8  ;;  %v106_v57 = vstv %s1176_s27  ;;  %p1052_p6 = scmp.lt.s32.totalorder %s770_s9, %s770_s9 }
  0x40   :  { %226 = vmatprep.subr.mxu0 %v195_v42  ;;  %92 = vst.msk [vmem:[#allocation2 + $0x8] sm:$0x1] %vm67_vm1, %v788_v54  ;;  %vm101_vm8 = vcmp.eq.s32.totalorder %v1163_v23, %v100_v55  ;;  %98 = vst.msk [vmem:[#allocation2 + $0x9] sm:$0x1] %vm67_vm1, %v790_v56  ;;  %vm107_vm9 = vcmp.eq.s32.totalorder %v1163_v23, %v106_v57  ;;  %v112_v60 = vstv %s1181_s28  ;;  %v118_v63 = vstv %s1187_s29  ;;  %v198_v28 = vld [vmem:[#allocation7 + $0x110] sm:$0xff]  ;;  %v163_v29 = vld [vmem:[#allocation2 + $0x20] sm:$0xff] }
  0x41   :  { %944 = vmatpush1.bf16.msra.mxu1 %v943_v43  ;;  %v792_v59 = vsel %vm101_vm8, 1.0, %v1084_v8  ;;  %v946_v61 = vpack.c.bf16 %v173_v53, %v1199_v51  ;;  %v794_v62 = vsel %vm107_vm9, 1.0, %v1084_v8  ;;  %vm113_vm10 = vcmp.eq.s32.totalorder %v1163_v23, %v112_v60  ;;  %v651_v30 = vld [vmem:[#allocation8] sm:$0xff]  ;;  %v652_v31 = vld [vmem:[#allocation8 + $0x8] sm:$0xff]  ;;  %v653_v33 = vld [vmem:[#allocation8 + $0x10] sm:$0xff]  ;;  %s1047_s10 = scalar_lea.vmem %s770_s9, 32 }
  0x42   :  { %320 = vmatprep.subr.mxu1 %v197_v48  ;;  %104 = vst.msk [vmem:[#allocation2 + $0xa] sm:$0x1] %vm67_vm1, %v792_v59  ;;  %110 = vst.msk [vmem:[#allocation2 + $0xb] sm:$0x1] %vm67_vm1, %v794_v62  ;;  %v796_v1 = vsel %vm113_vm10, 1.0, %v1084_v8  ;;  %vm119_vm11 = vcmp.eq.s32.totalorder %v1163_v23, %v118_v63  ;;  %v124_v2 = vstv %s1193_s30  ;;  %v130_v4 = vstv %s1195_s4  ;;  %v654_v34 = vld [vmem:[#allocation8 + $0x18] sm:$0xff]  ;;  %p1048_p5 = scmp.ne.s32.totalorder %s770_s9, %s1047_s10  ;;  %p1053_p7 = scmp.lt.s32.totalorder %s1047_s10, %s1047_s10 }
  0x43   :  { %227 = vmatpush1.msra.mxu0 %v194_v46  ;;  %116 = vst.msk [vmem:[#allocation2 + $0x14] sm:$0x1] %vm67_vm1, %v796_v1  ;;  %v798_v5 = vsel %vm119_vm11, 1.0, %v1084_v8  ;;  %vm125_vm12 = vcmp.eq.s32.totalorder %v1163_v23, %v124_v2  ;;  %vm131_vm13 = vcmp.eq.s32.totalorder %v1163_v23, %v130_v4  ;;  %v136_v6 = vstv %s1203_s0  ;;  %v655_v36 = vld [vmem:[#allocation8 + $0x20] sm:$0xff]  ;;  %v656_v37 = vld [vmem:[#allocation8 + $0x28] sm:$0xff]  ;;  %v658_v39 = vld [vmem:[#allocation8 + $0x38] sm:$0xff] }
  0x44   :  { %945 = vmatprep.subr.bf16.mxu0 %v1085_v0  ;;  %122 = vst.msk [vmem:[#allocation2 + $0x15] sm:$0x1] %vm67_vm1, %v798_v5  ;;  %v800_v10 = vsel %vm125_vm12, 1.0, %v1084_v8  ;;  %v802_v11 = vsel %vm131_vm13, 1.0, %v1084_v8  ;;  %vm137_vm14 = vcmp.eq.s32.totalorder %v1163_v23, %v136_v6  ;;  %v142_v12 = vstv %s1205_s5  ;;  %v659_v41 = vld [vmem:[#allocation8 + $0x40] sm:$0xff]  ;;  %v660_v42 = vld [vmem:[#allocation8 + $0x48] sm:$0xff]  ;;  %p1054_p8 = por %p1053_p7, %p1052_p6 }
  0x45   :  { %321 = vmatpush1.msra.mxu1 %v196_v58  ;;  %128 = vst.msk [vmem:[#allocation2 + $0x16] sm:$0x1] %vm67_vm1, %v800_v10  ;;  %134 = vst.msk [vmem:[#allocation2 + $0x17] sm:$0x1] %vm67_vm1, %v802_v11  ;;  %v804_v14 = vsel %vm137_vm14, 1.0, %v1084_v8  ;;  %vm143_vm15 = vcmp.eq.s32.totalorder %v1163_v23, %v142_v12  ;;  %v148_v15 = vstv %s1211_s6  ;;  %v154_v16 = vstv %s1213_s7  ;;  %v661_v44 = vld [vmem:[#allocation8 + $0x50] sm:$0xff] }
  0x46   :  { %954 = vmatprep.subr.bf16.mxu1 %v1085_v0  ;;  %v159_v13 = vld [vmem:[#allocation2] sm:$0xff]  ;;  %140 = vst.msk [vmem:[#allocation2 + $0x18] sm:$0x1] %vm67_vm1, %v804_v14  ;;  %v806_v17 = vsel %vm143_vm15, 1.0, %v1084_v8  ;;  %vm149_vm2 = vcmp.eq.s32.totalorder %v1163_v23, %v148_v15  ;;  %vm155_vm3 = vcmp.eq.s32.totalorder %v1163_v23, %v154_v16  ;;  %v949_v18 = vpack.c.bf16 %v183_v9, %v178_v7  ;;  %v662_v45 = vld [vmem:[#allocation8 + $0x58] sm:$0xff]  ;;  %v664_v48 = vld [vmem:[#allocation8 + $0x68] sm:$0xff]  ;;  %p1055_p9 = pnand %p1054_p8, %p1048_p5 }
  0x47   :  { %811 = vmatmul.mubr.msk.f32.vlgmr.msra.gmra.mrb[0].mxu0 %vm54_vm0, %v159_v13  ;;  %816 = vmatmul.mubr.msk.f32.vlgmr.msra.gmra.mrb[0].mxu1 %vm54_vm0, %v159_v13  ;;  %146 = vst.msk [vmem:[#allocation2 + $0x19] sm:$0x1] %vm67_vm1, %v806_v17  ;;  %v808_v19 = vsel %vm149_vm2, 1.0, %v1084_v8  ;;  %v810_v20 = vsel %vm155_vm3, 1.0, %v1084_v8  ;;  %v952_v25 = vpack.c.bf16 %v193_v22, %v188_v21  ;;  %v955_v32 = vpack.c.bf16 %v652_v31, %v651_v30  ;;  %v663_v47 = vld [vmem:[#allocation8 + $0x60] sm:$0xff]  ;;  %v665_v50 = vld [vmem:[#allocation8 + $0x70] sm:$0xff] }
  0x48   :  { %947 = vmatpush3.bf16.msra.mxu0 %v946_v61  ;;  %284 = vmatprep.mubr.f32.mxu0 %v1084_v8  ;;  %152 = vst.msk [vmem:[#allocation2 + $0x1a] sm:$0x1] %vm67_vm1, %v808_v19  ;;  %158 = vst.msk [vmem:[#allocation2 + $0x1b] sm:$0x1] %vm67_vm1, %v810_v20  ;;  %vm1086_vm1 = vmmov 0   ;;  %v958_v35 = vpack.c.bf16 %v654_v34, %v653_v33  ;;  %v961_v38 = vpack.c.bf16 %v656_v37, %v655_v36  ;;  %v666_v51 = vld [vmem:[#allocation8 + $0x78] sm:$0xff] }
  0x49   :  { %948 = vmatprep.subr.bf16.mxu0 %v1085_v0  ;;  %378 = vmatprep.mubr.f32.mxu1 %v1084_v8  ;;  %v160_v24 = vld [vmem:[#allocation2 + $0x8] sm:$0xff]  ;;  %v967_v43 = vpack.c.bf16 %v660_v42, %v659_v41  ;;  %v970_v46 = vpack.c.bf16 %v662_v45, %v661_v44  ;;  %v973_v49 = vpack.c.bf16 %v664_v48, %v663_v47  ;;  %vm498_vm4 = vcmask 1046528  }
  0x4a   :  { %956 = vmatpush3.bf16.msra.mxu1 %v955_v32  ;;  %v976_v52 = vpack.c.bf16 %v666_v51, %v665_v50  ;;  %vm544_vm5 = vcmask 1044480   ;;  %vm590_vm6 = vcmp.lt.s32.totalorder %v1163_v23, 32  ;;  %vm602_vm8 = vcmp.ge.s32.totalorder %v1163_v23, 32 }
  0x4b   :  { %812 = vmatmul.mubr.msk.f32.gmra.mrb[2].mxu0 %vm54_vm0, %v160_v24  ;;  %817 = vmatmul.mubr.msk.f32.gmra.mrb[2].mxu1 %vm54_vm0, %v160_v24  ;;  %vm603_vm9 = vcmp.lt.s32.totalorder %v1163_v23, 64  ;;  %vm588_vm11 = vcmp.ge.s32.totalorder %v1163_v23, 96 }
  0x4c   :  { %950 = vmatpush3.bf16.msra.mxu0 %v949_v18  ;;  %290 = vmatprep.mubr.f32.mxu0 %v1084_v8  ;;  %v161_v26 = vld [vmem:[#allocation2 + $0x10] sm:$0xff]  ;;  %v586_v18 = vshrl.u32 %v60_v3, 7  ;;  %vm1317_vm13 = vmand %vm602_vm8, %vm603_vm9 }
  0x4d   :  { %384 = vmatprep.mubr.f32.mxu1 %v1084_v8  ;;  %951 = vmatprep.subr.bf16.mxu0 %v1085_v0 }
  0x4e   :  { %957 = vmatprep.subr.bf16.mxu1 %v1085_v0  ;;  %vm592_vm7 = vcmp.ge.s32.totalorder %v586_v18, 2 }
  0x4f   :  { %813 = vmatmul.mubr.msk.f32.gmra.mrb[4].mxu0 %vm54_vm0, %v161_v26  ;;  %818 = vmatmul.mubr.msk.f32.gmra.mrb[4].mxu1 %vm54_vm0, %v161_v26  ;;  %v162_v27 = vld [vmem:[#allocation2 + $0x18] sm:$0xff]  ;;  %vm594_vm12 = vmand %vm590_vm6, %vm592_vm7 }
  0x50   :  { %296 = vmatprep.mubr.f32.mxu0 %v1084_v8  ;;  %953 = vmatpush3.bf16.msra.mxu0 %v952_v25  ;;  %vm1328_vm15 = vmor %vm588_vm11, %vm594_vm12 }
  0x51   :  { %390 = vmatprep.mubr.f32.mxu1 %v1084_v8  ;;  %869 = vmatprep.subr.mxu0 %v1084_v8  ;;  %vm1335_vm3 = vmand %vm1317_vm13, %vm592_vm7 }
  0x52   :  { %959 = vmatpush3.bf16.msra.mxu1 %v958_v35  ;;  %vm611_vm7 = vmor %vm1328_vm15, %vm1335_vm3 }
  0x53   :  { %814 = vmatmul.mubr.msk.f32.gmra.mrb[6].mxu0 %vm54_vm0, %v162_v27  ;;  %819 = vmatmul.mubr.msk.f32.gmra.mrb[6].mxu1 %vm54_vm0, %v162_v27 }
  0x54   :  { %302 = vmatprep.mubr.f32.mxu0 %v1084_v8  ;;  %870 = vmatpush3.msra.mxu0 %v198_v28 }
  0x55   :  { %396 = vmatprep.mubr.f32.mxu1 %v1084_v8  ;;  %960 = vmatprep.subr.bf16.mxu1 %v1085_v0 }
  0x56   :  { %962 = vmatpush3.bf16.msra.mxu1 %v961_v38 }
  0x57   :  { %815 = vmatmul.mubr.msk.f32.gmra.mrb[8].mxu0 %vm54_vm0, %v163_v29  ;;  %820 = vmatmul.mubr.msk.f32.gmra.mrb[8].mxu1 %vm54_vm0, %v163_v29 }
  0x58   :  { %871 = vmatprep.mubr.msk.f32.mxu0 %vm1086_vm1, %v1084_v8  ;;  %918 = vmatprep.mubr.msk.f32.mxu1 %vm1086_vm1, %v1084_v8 }
  0x59   :  { %963 = vmatprep.subr.bf16.mxu1 %v1085_v0 }
  0x5b   :  { %872 = vmatmul.mubr.msk.f32.vlgmr.msra.gmra.mrb[10].mxu0 %vm54_vm0, %v159_v13 }
  0x5c   :  { %874 = vmatprep.mubr.msk.f32.mxu0 %vm1086_vm1, %v1084_v8 }
  0x5f   :  { %875 = vmatmul.mubr.msk.f32.gmra.mrb[12].mxu0 %vm54_vm0, %v160_v24 }
  0x60   :  { %877 = vmatprep.mubr.msk.f32.mxu0 %vm1086_vm1, %v1084_v8 }
  0x63   :  { %878 = vmatmul.mubr.msk.f32.gmra.mrb[14].mxu0 %vm54_vm0, %v161_v26 }
  0x64   :  { %880 = vmatprep.mubr.msk.f32.mxu0 %vm1086_vm1, %v1084_v8 }
  0x67   :  { %881 = vmatmul.mubr.msk.f32.gmra.mrb[16].mxu0 %vm54_vm0, %v162_v27 }
  0x68   :  { %883 = vmatprep.mubr.msk.f32.mxu0 %vm1086_vm1, %v1084_v8  ;;  %v657_v8 = vld [vmem:[#allocation8 + $0x30] sm:$0xff]  ;;  %vm613_vm1 = vcmp.ge.s32.totalorder %v1163_v23, 64 }
  0x69   :  { %v964_v40 = vpack.c.bf16 %v658_v39, %v657_v8 }
  0x6b   :  { %884 = vmatmul.mubr.msk.f32.gmra.mrb[18].mxu0 %vm54_vm0, %v163_v29  ;;  %965 = vmatpush3.bf16.msra.mxu1 %v964_v40  ;;  %vm521_vm0 = vcmask 1045504   ;;  %v587_v29 = vadd.s32 8, %v586_v18 }
  0x6c   :  { %966 = vmatprep.subr.bf16.mxu1 %v1085_v0 }
  0x6d   :  { %vm597_vm10 = vcmp.lt.s32.totalorder %v587_v29, 12  ;;  %vm608_vm2 = vcmp.lt.s32.totalorder %v587_v29, 11 }
  0x6e   :  { %vm599_vm14 = vmand %vm590_vm6, %vm597_vm10 }
  0x6f   :  { %968 = vmatpush3.bf16.msra.mxu1 %v967_v43  ;;  %vm1349_vm6 = vmand %vm1317_vm13, %vm608_vm2 }
  0x70   :  { %969 = vmatprep.subr.bf16.mxu1 %v1085_v0 }
  0x73   :  { %971 = vmatpush3.bf16.msra.mxu1 %v970_v46 }
  0x74   :  { %972 = vmatprep.subr.bf16.mxu1 %v1085_v0 }
  0x77   :  { %974 = vmatpush3.bf16.msra.mxu1 %v973_v49 }
  0x78   :  { %975 = vmatprep.subr.bf16.mxu1 %v1085_v0 }
  0x7b   :  { %977 = vmatpush3.bf16.msra.mxu1 %v976_v52 }
 0x11a   :  { %v280_v53 = vpop.f32.mrb[0].mxu0  ;;  %v374_v54 = vpop.f32.mrb[0].mxu1 }
 0x11b   :  { %v282_v55 = vpop.f32.mrb[1].mxu0  ;;  %v376_v56 = vpop.f32.mrb[1].mxu1  ;;  %v522_v57 = vrot.slane %v374_v54, 2 }
 0x11c   :  { %v545_v59 = vrot.slane %v376_v56, 3  ;;  %v499_v1 = vrot.slane %v282_v55, 1 }
 0x11e   :  { %v286_v58 = vpop.f32.mrb[2].mxu0  ;;  %v380_v60 = vpop.f32.mrb[2].mxu1 }
 0x11f   :  { %v288_v61 = vpop.f32.mrb[3].mxu0  ;;  %v523_v62 = vrot.slane %v380_v60, 2  ;;  %v382_v63 = vpop.f32.mrb[3].mxu1 }
 0x120   :  { %v500_v2 = vrot.slane %v288_v61, 1  ;;  %v546_v4 = vrot.slane %v382_v63, 3 }
 0x121   :  { %v524_v0 = vsel %vm521_vm0, %v522_v57, %v523_v62 }
 0x122   :  { %v501_v5 = vsel %vm498_vm4, %v499_v1, %v500_v2  ;;  %v292_v6 = vpop.f32.mrb[4].mxu0  ;;  %v547_v7 = vsel %vm544_vm5, %v545_v59, %v546_v4  ;;  %v386_v9 = vpop.f32.mrb[4].mxu1 }
 0x123   :  { %v512_v10 = vadd.f32 %v501_v5, %v280_v53  ;;  %v294_v11 = vpop.f32.mrb[5].mxu0  ;;  %v525_v12 = vrot.slane %v386_v9, 2  ;;  %v388_v13 = vpop.f32.mrb[5].mxu1 }
 0x124   :  { %v502_v14 = vrot.slane %v294_v11, 1  ;;  %v548_v15 = vrot.slane %v388_v13, 3 }
 0x125   :  { %v535_v16 = vadd.f32 %v524_v0, %v512_v10  ;;  %v526_v17 = vsel %vm521_vm0, %v523_v62, %v525_v12 }
 0x126   :  { %v503_v19 = vsel %vm498_vm4, %v500_v2, %v502_v14  ;;  %v298_v20 = vpop.f32.mrb[6].mxu0  ;;  %v549_v21 = vsel %vm544_vm5, %v546_v4, %v548_v15  ;;  %v392_v22 = vpop.f32.mrb[6].mxu1 }
 0x127   :  { %v513_v24 = vadd.f32 %v503_v19, %v286_v58  ;;  %v558_v25 = vadd.f32 %v547_v7, %v535_v16  ;;  %v300_v26 = vpop.f32.mrb[7].mxu0  ;;  %v527_v27 = vrot.slane %v392_v22, 2  ;;  %v394_v28 = vpop.f32.mrb[7].mxu1 }
 0x128   :  { %v504_v30 = vrot.slane %v300_v26, 1  ;;  %v550_v31 = vrot.slane %v394_v28, 3 }
 0x129   :  { %v536_v32 = vadd.f32 %v526_v17, %v513_v24  ;;  %v528_v33 = vsel %vm521_vm0, %v525_v12, %v527_v27 }
 0x12a   :  { %v505_v3 = vsel %vm498_vm4, %v502_v14, %v504_v30  ;;  %v304_v34 = vpop.f32.mrb[8].mxu0  ;;  %v551_v35 = vsel %vm544_vm5, %v548_v15, %v550_v31  ;;  %v398_v36 = vpop.f32.mrb[8].mxu1 }
 0x12b   :  { %v514_v37 = vadd.f32 %v505_v3, %v292_v6  ;;  %v559_v38 = vadd.f32 %v549_v21, %v536_v32  ;;  %v305_v8 = vpop.f32.mrb[9].mxu0  ;;  %v529_v39 = vrot.slane %v398_v36, 2  ;;  %v400_v40 = vpop.f32.mrb[9].mxu1 }
 0x12c   :  { %v506_v41 = vrot.slane %v305_v8, 1  ;;  %v552_v42 = vrot.slane %v400_v40, 3 }
 0x12d   :  { %v537_v43 = vadd.f32 %v528_v33, %v514_v37  ;;  %v530_v44 = vsel %vm521_vm0, %v527_v27, %v529_v39  ;;  %vm614_vm0 = vcmp.lt.s32.totalorder %v1163_v23, 96 }
 0x12e   :  { %v507_v46 = vsel %vm498_vm4, %v504_v30, %v506_v41  ;;  %v469_v47 = vpop.f32.mrb[10].mxu0  ;;  %v553_v48 = vsel %vm544_vm5, %v550_v31, %v552_v42  ;;  %vm1343_vm4 = vmor %vm588_vm11, %vm599_vm14  ;;  %vm567_vm5 = vcmask 1043456   ;;  %v827_v42 = vld [vmem:[#allocation8 + $0x81] ss:$0 sm:$0xff]  ;;  %vm749_vm14 = vcmask 25600  }
 0x12f   :  { %v515_v49 = vadd.f32 %v507_v46, %v298_v20  ;;  %v560_v50 = vadd.f32 %v551_v35, %v537_v43  ;;  %v873_v51 = vpop.f32.mrb[11].mxu0  ;;  %v568_v58 = vrot.slane %v469_v47, 4  ;;  %vm615_vm8 = vmand %vm613_vm1, %vm614_vm0  ;;  %v826_v35 = vld [vmem:[#allocation8 + $0x80] ss:$0 sm:$0xff] }
 0x130   :  { %vm612_vm9 = vmor %vm1343_vm4, %vm1349_vm6 }
 0x131   :  { %v538_v54 = vadd.f32 %v530_v44, %v515_v49  ;;  %vm621_vm11 = vmand %vm615_vm8, %vm597_vm10  ;;  %vm671_vm10 = vcmask 1041409  }
 0x132   :  { %v474_v56 = vpop.f32.mrb[12].mxu0  ;;  %vm1363_vm12 = vmor %vm611_vm7, %vm615_vm8 }
 0x133   :  { %v561_v59 = vadd.f32 %v553_v48, %v538_v54  ;;  %v569_v60 = vrot.slane %v474_v56, 4  ;;  %v876_v23 = vpop.f32.mrb[13].mxu0  ;;  %vm1368_vm13 = vmor %vm612_vm9, %vm621_vm11 }
 0x135   :  { %v570_v61 = vsel %vm567_vm5, %v568_v58, %v569_v60 }
 0x136   :  { %v581_v62 = vadd.f32 %v570_v61, %v558_v25  ;;  %v479_v63 = vpop.f32.mrb[14].mxu0 }
 0x137   :  { %v571_v1 = vrot.slane %v479_v63, 4  ;;  %v879_v2 = vpop.f32.mrb[15].mxu0 }
 0x138   :  { %v624_v11 = vsel %vm1363_vm12, %v581_v62, -1e+30 }
 0x139   :  { %v572_v0 = vsel %vm567_vm5, %v569_v60, %v571_v1 }
 0x13a   :  { %v582_v6 = vadd.f32 %v572_v0, %v559_v38  ;;  %v484_v7 = vpop.f32.mrb[16].mxu0 }
 0x13b   :  { %v573_v9 = vrot.slane %v484_v7, 4  ;;  %v882_v10 = vpop.f32.mrb[17].mxu0 }
 0x13c   :  { %v625_v12 = vsel %vm1368_vm13, %v582_v6, -1e+30 }
 0x13d   :  { %v628_v13 = vmax.f32 %v624_v11, %v625_v12  ;;  %v574_v14 = vsel %vm567_vm5, %v571_v1, %v573_v9 }
 0x13e   :  { %v583_v15 = vadd.f32 %v574_v14, %v560_v50  ;;  %v489_v16 = vpop.f32.mrb[18].mxu0 }
 0x13f   :  { %v629_v17 = vrot.slane %v628_v13, 4  ;;  %v575_v18 = vrot.slane %v489_v16, 4  ;;  %v885_v19 = vpop.f32.mrb[19].mxu0 }
 0x140   :  { %v626_v25 = vsel %vm1363_vm12, %v583_v15, -1e+30 }
 0x141   :  { %v630_v20 = vmax.f32 %v628_v13, %v629_v17  ;;  %v576_v21 = vsel %vm567_vm5, %v573_v9, %v575_v18 }
 0x142   :  { %v584_v22 = vadd.f32 %v576_v21, %v561_v59 }
 0x143   :  { %v631_v24 = vrot.slane %v630_v20, 2 }
 0x144   :  { %v627_v26 = vsel %vm1368_vm13, %v584_v22, -1e+30 }
 0x145   :  { %v635_v27 = vmax.f32 %v626_v25, %v627_v26  ;;  %v632_v28 = vmax.f32 %v630_v20, %v631_v24 }
 0x147   :  { %v636_v29 = vrot.slane %v635_v27, 4  ;;  %v633_v32 = vrot.slane %v632_v28, 1 }
 0x149   :  { %v637_v30 = vmax.f32 %v635_v27, %v636_v29  ;;  %v634_v34 = vmax.f32 %v632_v28, %v633_v32 }
 0x14b   :  { %v638_v31 = vrot.slane %v637_v30, 2  ;;  %v647_v37 = vadd.f32 %v826_v35, %v634_v34 }
 0x14d   :  { %v639_v33 = vmax.f32 %v637_v30, %v638_v31  ;;  %v649_v39 = vmax.f32 %v647_v37, 0.0 }
 0x14f   :  { %v640_v3 = vrot.slane %v639_v33, 1 }
 0x151   :  { %v641_v36 = vmax.f32 %v639_v33, %v640_v3 }
 0x153   :  { %v648_v38 = vadd.f32 %v826_v35, %v641_v36 }
 0x155   :  { %v650_v8 = vmax.f32 %v648_v38, 0.0 }
 0x157   :  { %v670_v40 = vrot.slane %v650_v8, 7 }
 0x159   :  { %v672_v41 = vsel %vm671_vm10, %v670_v40, %v649_v39 }
 0x15a   :  { %919 = vmatmul.mubr.f32.vlgmr.msra.gmra.mrb[10].mxu1 %v672_v41 }
 0x22d   :  { %v740_v43 = vpop.f32.mrb[10].mxu1 }
 0x22e   :  { %v748_v44 = vadd.f32 %v827_v42, %v740_v43  ;;  %v920_v45 = vpop.f32.mrb[11].mxu1 }
 0x230   :  { %v750_v46 = vsel %vm749_vm14, %v748_v44, -inf }
 0x231   :  { %751 = vmax.xlane.f32.xlu0 %v750_v46 }
 0x2be   :  { %v752_v47 = vpop.xlane.xlu0 %751 }
 0x2bf   :  { %v753_v48 = vsub.f32 %v748_v44, %v752_v47 }
 0x2c1   :  { %v754_v49 = vmul.f32 1.442695, %v753_v48 }
 0x2c3   :  { %989 = vpow2.f32 %v754_v49 }
 0x2cd   :  { %v990_v50 = vpop.eup %989 }
 0x2ce   :  { %v756_v51 = vsel %vm749_vm14, %v990_v50, 0.0 }
 0x2cf   :  { %757 = vadd.xlane.f32.xlu0 %v756_v51 }
 0x35c   :  { %v758_v52 = vpop.xlane.xlu0 %757 }
 0x35d   :  { %991 = vlog2.f32 %v758_v52 }
 0x367   :  { %v992_v53 = vpop.eup %991 }
 0x368   :  { %v760_v54 = vmul.f32 0.6931472, %v992_v53 }
 0x36a   :  { %v761_v55 = vsub.f32 %v753_v48, %v760_v54 }
 0x36c   :  { %762 = vst.msk [vmem:[#allocation10] sm:$0x3] %vm749_vm14, %v761_v55 }
 0x36d   :  { %1058 = shalt.err (!%p1055_p9)
}
 0x36e   :  { %s1059_s13 = scalar_lea.hbm %s1400_s3, 32 }
 0x36f   :  { %p1060_p10 = scmp.ne.s32.totalorder %s1400_s3, %s1059_s13  ;;  %p1063_p11 = scmp.lt.u32.totalorder %s1059_s13, %s1400_s3 }
 0x371   :  { %p1065_p12 = pnand %p1063_p11, %p1060_p10 }
 0x373   :  { %1068 = shalt.err (!%p1065_p12)
}
 0x374   :  { %772 = dma.vmem_to_hbm [thread:$0]  %s770_s9, 32, %s1400_s3, [#allocation5]  }
 0x375   :  { %1075 = dma.done.wait [#allocation5], 32  }
 0x376   :  { %1076 = vsyncadd [#allocation5], 4294967264 }
 0x377   :  { %776 = vsyncpa [#allocation4], 1 }
 0x378   :  { %777 = vsyncpa [#allocation9], 1 }
 0x379   :  { %778 = vsyncpa [#allocation5], 1 }
 0x37a   :  { %779 = vsyncpa [#allocation6], 1 }

</bundles_post_ra>
